<compile_context>
chip_gen: v6e
topology: v6e:2x2x1
jax: 0.10.0
libtpu: 0.0.40
codegen_flags: <defaults>
</compile_context>

<pallas_src>
import functools

import jax
import jax.numpy as jnp
import numpy as np
from jax.experimental import pallas as pl
from jax.experimental.pallas import tpu as pltpu


# ----------------------------------------------------------------------------
# PE table (matches the PyTorch buffer): shape (max_seq, 1, d_model), float32.
# ----------------------------------------------------------------------------
def _build_pe(d_model: int, max_seq_length: int = 5000) -> jnp.ndarray:
    position = np.arange(0, max_seq_length, dtype=np.float32)[:, None]        # (L, 1)
    div_term = np.exp(np.arange(0, d_model, 2, dtype=np.float32)
                      * -(np.log(10000.0) / d_model))                          # (D//2,)
    pe = np.zeros((max_seq_length, d_model), dtype=np.float32)
    pe[:, 0::2] = np.sin(position * div_term)
    pe[:, 1::2] = np.cos(position * div_term)
    return jnp.asarray(pe[:, None, :])                                         # (L, 1, D)


# ----------------------------------------------------------------------------
# Kernels
# ----------------------------------------------------------------------------
def _add_kernel(x_ref, pe_ref, o_ref):
    # Path A: blocks are shape-identical (tile_s, D).
    # Path C: x/o blocks are (tile_s, tile_b, D), pe block is (tile_s, 1, D)
    #         and broadcasts over the batch tile.
    o_ref[...] = (x_ref[...] + pe_ref[...]).astype(o_ref.dtype)


def _add_tiled_pe_kernel(x_ref, pe_ref, o_ref, *, batch: int):
    # Path B: x/o are a lane-dense (tile_s, B*D) slab; pe is (tile_s, D) and is
    # replicated along lanes so slab[s, b*D + d] gets pe[s, d].
    pe_tile = pe_ref[...]
    if batch > 1:
        pe_tile = jnp.tile(pe_tile, (1, batch))
    o_ref[...] = (x_ref[...] + pe_tile).astype(o_ref.dtype)


# ----------------------------------------------------------------------------
# Tiling helpers
# ----------------------------------------------------------------------------
def _round_up(n: int, m: int) -> int:
    return ((n + m - 1) // m) * m


def _choose_tile_s(S: int, row_bytes: int, target_bytes: int) -> int:
    """Sequence tile: multiple of 8, block bytes <= ~target_bytes, and capped at
    ~S/4 so the parallel S axis has >=4 steps (keeps both v7x TCs pipelined)."""
    if S <= 8:
        return S  # single full-extent block
    t = max(8, (target_bytes // max(row_bytes, 1)) // 8 * 8)
    quarter = max(8, _round_up((S + 3) // 4, 8))
    t = min(t, quarter, _round_up(S, 8))
    return max(8, t)


# ----------------------------------------------------------------------------
# Forward
# ----------------------------------------------------------------------------
def positional_encoding_forward(x: jnp.ndarray, pe: jnp.ndarray, *,
                                target_block_bytes: int = 4 * 1024 * 1024,
                                donate_x: bool = False) -> jnp.ndarray:
    """x: (S, B, D); pe: (max_seq, 1, D). Returns x + pe[:S] (broadcast over B)."""
    S, B, D = x.shape
    max_seq = pe.shape[0]
    assert S <= max_seq, f"sequence length {S} exceeds max_seq_length {max_seq}"

    itemsize = jnp.dtype(x.dtype).itemsize
    # Cast pe to x.dtype once: native-width VPU add and half the pe DMA bytes
    # for bf16 activations.
    pe = pe.astype(x.dtype)

    io_alias = {0: 0} if donate_x else {}
    # 32 MiB is explicit (v5e scoped default is 16 MiB) and leaves headroom on
    # v7x (64 MiB physical); worst-case double-buffered footprint here ~24 MiB.
    vmem_limit = 32 * 1024 * 1024

    use_path_a = S >= 8 and (D % 128 == 0 or B == 1)
    use_path_b = (not use_path_a) and S >= 8 and 8 * B * D * itemsize <= target_block_bytes

    if use_path_a:
        # ------------------------------------------------------------------
        # Path A: 2-D grid over (S-tiles, batch); no pe replication in-kernel,
        # full-lane D-wide stores when D % 128 == 0, S_tiles*B parallel steps.
        # ------------------------------------------------------------------
        x2 = x.reshape(S, B * D)                   # contiguous -> metadata-only view
        pe2 = pe.reshape(max_seq, D)
        tile_s = _choose_tile_s(S, row_bytes=D * itemsize,
                                target_bytes=target_block_bytes)
        out2 = pl.pallas_call(
            _add_kernel,
            out_shape=jax.ShapeDtypeStruct((S, B * D), x.dtype),
            grid_spec=pltpu.PrefetchScalarGridSpec(
                num_scalar_prefetch=0,
                grid=(pl.cdiv(S, tile_s), B),
                in_specs=[
                    pl.BlockSpec((tile_s, D), lambda i, b: (i, b)),   # batch column b
                    pl.BlockSpec((tile_s, D), lambda i, b: (i, 0)),   # pe row block i
                ],
                out_specs=pl.BlockSpec((tile_s, D), lambda i, b: (i, b)),
            ),
            compiler_params=pltpu.CompilerParams(
                dimension_semantics=("parallel", "parallel"),
                vmem_limit_bytes=vmem_limit,
            ),
            input_output_aliases=io_alias,
        )(x2, pe2)
        return out2.reshape(S, B, D)

    if use_path_b:
        # ------------------------------------------------------------------
        # Path B (D % 128 != 0, modest B*D): lane-dense (S, B*D) slab, 1-D grid
        # over S tiles, pe replicated along lanes inside the kernel.
        # ------------------------------------------------------------------
        x2 = x.reshape(S, B * D)
        pe2 = pe.reshape(max_seq, D)
        tile_s = _choose_tile_s(S, row_bytes=B * D * itemsize,
                                target_bytes=target_block_bytes)
        out2 = pl.pallas_call(
            functools.partial(_add_tiled_pe_kernel, batch=B),
            out_shape=jax.ShapeDtypeStruct((S, B * D), x.dtype),
            grid_spec=pltpu.PrefetchScalarGridSpec(
                num_scalar_prefetch=0,
                grid=(pl.cdiv(S, tile_s),),
                in_specs=[
                    pl.BlockSpec((tile_s, B * D), lambda i: (i, 0)),
                    pl.BlockSpec((tile_s, D), lambda i: (i, 0)),
                ],
                out_specs=pl.BlockSpec((tile_s, B * D), lambda i: (i, 0)),
            ),
            compiler_params=pltpu.CompilerParams(
                dimension_semantics=("parallel",),
                vmem_limit_bytes=vmem_limit,
            ),
            input_output_aliases=io_alias,
        )(x2, pe2)
        return out2.reshape(S, B, D)

    # ----------------------------------------------------------------------
    # Path C (guard): tiny S, or unaligned D with B*D so large that even an
    # 8-row slab block would blow the block budget.  Tile the batch axis too:
    # 3-D blocks keep block bytes bounded; pe stays (max_seq, 1, D) and
    # broadcasts over the batch tile inside the kernel.
    # ----------------------------------------------------------------------
    tile_s = 8 if S > 8 else S
    if B <= 8:
        tile_b = B
    else:
        tile_b = max(8, (target_block_bytes // max(tile_s * D * itemsize, 1)) // 8 * 8)
        tile_b = min(tile_b, (B // 8) * 8)
    # TODO(synk): could grow tile_s further when tile_b == B and budget allows.
    out = pl.pallas_call(
        _add_kernel,
        out_shape=jax.ShapeDtypeStruct((S, B, D), x.dtype),
        grid_spec=pltpu.PrefetchScalarGridSpec(
            num_scalar_prefetch=0,
            grid=(pl.cdiv(S, tile_s), pl.cdiv(B, tile_b)),
            in_specs=[
                pl.BlockSpec((tile_s, tile_b, D), lambda i, b: (i, b, 0)),
                pl.BlockSpec((tile_s, 1, D), lambda i, b: (i, 0, 0)),
            ],
            out_specs=pl.BlockSpec((tile_s, tile_b, D), lambda i, b: (i, b, 0)),
        ),
        compiler_params=pltpu.CompilerParams(
            dimension_semantics=("parallel", "parallel"),
            vmem_limit_bytes=vmem_limit,
        ),
        input_output_aliases=io_alias,
    )(x, pe)
    return out


if __name__ == "__main__":
    key = jax.random.PRNGKey(0)
    MAX_SEQ = 64  # small synthetic max_seq_length, large enough for all tests

    def _ref(x, pe):
        return x + pe[: x.shape[0]].astype(x.dtype)

    # --- Test 1: module's nominal small shapes (seq=8, batch=2, d_model=32).
    #     D % 128 != 0 -> lane-dense slab path (Path B).
    S, B, D = 8, 2, 32
    pe = _build_pe(D, MAX_SEQ)
    x = jax.random.normal(key, (S, B, D), dtype=jnp.float32)
    out = jax.block_until_ready(positional_encoding_forward(x, pe))
    assert out.shape == (S, B, D)
    assert jnp.allclose(out, _ref(x, pe), atol=1e-6, rtol=1e-6), "Path B mismatch"

    # --- Test 2: lane-aligned d_model + non-divisible sequence length
    #     (partial trailing S block) -> 2-D (S, batch) grid path (Path A).
    S, B, D = 12, 2, 128
    pe = _build_pe(D, MAX_SEQ)
    key, k2 = jax.random.split(key)
    x = jax.random.normal(k2, (S, B, D), dtype=jnp.float32)
    out = jax.block_until_ready(positional_encoding_forward(x, pe))
    assert jnp.allclose(out, _ref(x, pe), atol=1e-6, rtol=1e-6), "Path A mismatch"

    # --- Test 3: bf16 activations (exercises pe dtype cast + store astype).
    S, B, D = 8, 2, 128
    pe = _build_pe(D, MAX_SEQ)
    key, k3 = jax.random.split(key)
    x = jax.random.normal(k3, (S, B, D), dtype=jnp.bfloat16)
    out = jax.block_until_ready(positional_encoding_forward(x, pe))
    assert out.dtype == jnp.bfloat16
    assert jnp.allclose(out.astype(jnp.float32),
                        _ref(x.astype(jnp.float32), pe),
                        atol=5e-2, rtol=5e-2), "bf16 mismatch"

    # --- Test 4: force the batch-tiled guard path (Path C) with a tiny block
    #     budget (oversized slab rows must not blow VMEM).
    S, B, D = 8, 16, 32
    pe = _build_pe(D, MAX_SEQ)
    key, k4 = jax.random.split(key)
    x = jax.random.normal(k4, (S, B, D), dtype=jnp.float32)
    out = jax.block_until_ready(
        positional_encoding_forward(x, pe, target_block_bytes=4096))
    assert jnp.allclose(out, _ref(x, pe), atol=1e-6, rtol=1e-6), "Path C mismatch"

    print("KERNEL_OK")
</pallas_src>

<mosaic_0001>
module attributes {stable_mosaic.version = 11 : i64} {
  func.func @_add_tiled_pe_kernel(%arg0: i32, %arg1: memref<8x64xf32, #tpu.memory_space<vmem>>, %arg2: memref<8x32xf32, #tpu.memory_space<vmem>>, %arg3: memref<8x64xf32, #tpu.memory_space<vmem>>) attributes {dimension_semantics = [#tpu.dimension_semantics<parallel>], iteration_bounds = array<i64: 1>, scalar_prefetch = 0 : i64, scratch_operands = 0 : i64, tpu.core_type = #tpu.core_type<tc>, window_params = [{transform_indices = @transform_0, window_bounds = array<i64: 8, 64>}, {transform_indices = @transform_1, window_bounds = array<i64: 8, 32>}, {transform_indices = @transform_2, window_bounds = array<i64: 8, 64>}]} {
    %c0 = arith.constant 0 : index
    %c0_0 = arith.constant 0 : index
    %0 = vector.load %arg2[%c0, %c0_0] : memref<8x32xf32, #tpu.memory_space<vmem>>, vector<8x32xf32>
    %1 = tpu.concatenate %0, %0 in 1 : vector<8x32xf32>, vector<8x32xf32> -> vector<8x64xf32>
    %c0_1 = arith.constant 0 : index
    %c0_2 = arith.constant 0 : index
    %2 = vector.load %arg1[%c0_1, %c0_2] : memref<8x64xf32, #tpu.memory_space<vmem>>, vector<8x64xf32>
    %3 = arith.addf %2, %1 : vector<8x64xf32>
    %c0_3 = arith.constant 0 : index
    %c0_4 = arith.constant 0 : index
    %4 = vector.load %arg3[%c0_3, %c0_4] : memref<8x64xf32, #tpu.memory_space<vmem>>, vector<8x64xf32>
    tpu.vector_store %arg3[%c0_3, %c0_4], %3 {strides = array<i32>} : memref<8x64xf32, #tpu.memory_space<vmem>>, vector<8x64xf32>,
    return
  }
  func.func @transform_0(%arg0: i32) -> (i32, i32) {
    %c0_i32 = arith.constant 0 : i32
    %c0_i32_0 = arith.constant 0 : i32
    return %arg0, %c0_i32 : i32, i32
  }
  func.func @transform_1(%arg0: i32) -> (i32, i32) {
    %c0_i32 = arith.constant 0 : i32
    %c0_i32_0 = arith.constant 0 : i32
    return %arg0, %c0_i32 : i32, i32
  }
  func.func @transform_2(%arg0: i32) -> (i32, i32) {
    %c0_i32 = arith.constant 0 : i32
    %c0_i32_0 = arith.constant 0 : i32
    return %arg0, %c0_i32 : i32, i32
  }
}

</mosaic_0001>

<bundles_post_ra>
// kernel: tpu_custom_call.1
= control target key start
LH: loop header
LB: loop body
LE: loop exit
PB: predicated region body
PF: predicated region fallthrough
CT: control target
= control target key end

     0   :  { %s87_s0 = inlined_call_operand.vmem [shape: f32[8,64], index: 0, kind: input, shape index: {}]   ;;  %s88_s1 = inlined_call_operand.vmem [shape: f32[64,32], index: 1, kind: input, shape index: {}]   ;;  %s89_s2 = inlined_call_operand.hbm [shape: f32[8,64], index: 2, kind: output, shape index: {}]  }
   0x1   :  { %v12_v0 = vld [vmem:[%s88_s1] sm:$0xff] }
   0x2   :  { %7 = vsyncpa [#allocation3], 0  ;;  %s61_s11 = smov 32   ;;  %vm17_vm0 = vcmask 261120   ;;  %v19_v1 = vld [vmem:[%s87_s0] sm:$0xff]  ;;  %s62_s14 = smov [#allocation2]  }
   0x3   :  { %14 = vrot.lane.b32.xlu0 %v12_v0, %s61_s11  ;;  %s29_s15 = sshll.u32 %s62_s14, 4  ;;  %vm21_vm1 = vcmask 523264   ;;  %s30_s15 = int_to_ptr.vmem [resolvable:$true] %s29_s15 }
   0x4   :  { %s39_s16 = scalar_lea.vmem %s30_s15, 128  ;;  %p44_p1 = scmp.lt.s32.totalorder %s30_s15, %s30_s15 }
   0x5   :  { %p40_p0 = scmp.ne.s32.totalorder %s30_s15, %s39_s16  ;;  %p45_p2 = scmp.lt.s32.totalorder %s39_s16, %s39_s16 }
   0x7   :  { %p46_p3 = por %p45_p2, %p44_p1 }
   0x9   :  { %p47_p4 = pnand %p46_p3, %p40_p0 }
  0x75   :  { %v15_v2 = vpop.permute.xlu0 %14 }
  0x76   :  { %v18_v3 = vsel %vm17_vm0, %v12_v0, %v15_v2 }
  0x77   :  { %v20_v4 = vadd.f32 %v19_v1, %v18_v3 }
  0x79   :  { %22 = vst.msk [vmem:[#allocation2] sm:$0xff] %vm21_vm1, %v20_v4 }
  0x7a   :  { %50 = shalt.err (!%p47_p4)
}
  0x7b   :  { %32 = dma.vmem_to_hbm [thread:$0]  %s30_s15, 128, %s89_s2, [#allocation3]  }
  0x7c   :  { %59 = dma.done.wait [#allocation3], 128  }
  0x7d   :  { %60 = vsyncadd [#allocation3], 4294967168 }
  0x7e   :  { %36 = vsyncpa [#allocation3], 1 }

</bundles_post_ra>
